<compile_context>
chip_gen: v6e
topology: v6e:2x2x1
jax: 0.10.0
libtpu: 0.0.40
codegen_flags: <defaults>
</compile_context>

<pallas_src>
import functools

import jax
import jax.numpy as jnp
from jax import lax
from jax.experimental import pallas as pl
from jax.experimental.pallas import tpu as pltpu


def _ceil_to(v, m):
    return ((v + m - 1) // m) * m


def _row_sum_kernel(x_ref, o_ref, *, s_total, kh, t_s):
    """Accumulate per-row sums of x (tb, t_s, 128) into o (tb, 8, 128)."""
    p = pl.program_id(1)                 # which half of the spatial reduction
    k = pl.program_id(2)                 # step within the half (reduction axis)

    @pl.when(k == 0)
    def _init():
        o_ref[...] = jnp.zeros_like(o_ref)

    start = (p * kh + k) * t_s           # logical (unclamped) global s offset
    n_full = t_s // 8
    rem = t_s - n_full * 8               # nonzero only when t_s == s_total

    def _accumulate(masked):
        def body(i, acc):
            off = pl.multiple_of(i * 8, 8)
            xc = x_ref[:, pl.ds(off, 8), :].astype(jnp.float32)
            if masked:
                sidx = start + off + lax.broadcasted_iota(jnp.int32, xc.shape, 1)
                xc = jnp.where(sidx < s_total, xc, 0.0)
            return acc + xc

        acc = jnp.zeros(o_ref.shape, jnp.float32)
        if n_full > 0:
            acc = lax.fori_loop(0, n_full, body, acc, unroll=min(4, n_full))
        o_ref[...] += acc

        if rem:                          # static remainder chunk (< 8 sublanes)
            off = n_full * 8
            xc = x_ref[:, pl.ds(off, rem), :].astype(jnp.float32)
            if masked:
                sidx = start + off + lax.broadcasted_iota(jnp.int32, xc.shape, 1)
                xc = jnp.where(sidx < s_total, xc, 0.0)
            o_ref[:, :rem, :] += xc

    inside = start + t_s <= s_total      # block fully in-bounds -> no mask ops

    @pl.when(inside)
    def _fast():
        _accumulate(False)

    @pl.when(jnp.logical_not(inside))
    def _edge():
        _accumulate(True)


def l_color(x):
    """x: (B, 3, H, W) -> (B, 1, 1, 1); matches torch L_color.forward."""
    b, c, h, w = x.shape
    assert c == 3, "L_color expects RGB input (C == 3)"
    rows = b * c
    hw = h * w
    hw128 = _ceil_to(hw, 128)

    xr = x.reshape(rows, hw)
    if hw128 != hw:
        # Rare fallback: pad only to the next 128-lane boundary (zeros are
        # sum-neutral).  The common case (H*W % 128 == 0) takes no copy at all.
        xr = jnp.pad(xr, ((0, 0), (0, hw128 - hw)))
    s_total = hw128 // 128
    x3 = xr.reshape(rows, s_total, 128)              # free (contiguous) reshape

    itemsize = jnp.dtype(x.dtype).itemsize
    tb = min(rows, 16)                               # rows/block: bounds vreg pressure
    r_blocks = pl.cdiv(rows, tb)

    # Spatial tile: target ~8 MiB input blocks (amortizes the ~0.35us/step grid
    # overhead on all generations) while keeping double-buffered inputs + the
    # resident accumulator well inside a 32 MiB scoped-VMEM budget (v5e..v7x).
    t = (8 * 1024 * 1024) // (tb * 128 * itemsize)
    t = max(32, (t // 32) * 32)
    t_s = s_total if s_total <= t else t
    k_total = pl.cdiv(s_total, t_s)

    # Split the reduction into two independent halves so v7x's 2 TensorCores
    # both stream data (extra blocks just run sequentially on v5e/v6e).
    n_split = 2 if k_total >= 2 else 1
    kh = pl.cdiv(k_total, n_split)
    k_max = k_total - 1

    kernel = functools.partial(_row_sum_kernel, s_total=s_total, kh=kh, t_s=t_s)

    partial = pl.pallas_call(
        kernel,
        out_shape=jax.ShapeDtypeStruct((n_split, rows, 8, 128), jnp.float32),
        grid=(r_blocks, n_split, kh),
        in_specs=[pl.BlockSpec(
            (tb, t_s, 128),
            # clamp: the last half's tail step may be past the end; its data is
            # fully masked in-kernel, the clamp just keeps the DMA in bounds.
            lambda r, p, k: (r, jnp.minimum(p * kh + k, k_max), 0))],
        out_specs=pl.BlockSpec(
            (None, tb, 8, 128),
            lambda r, p, k: (p, r, 0, 0)),
        compiler_params=pltpu.CompilerParams(
            dimension_semantics=("parallel", "parallel", "arbitrary"),
            vmem_limit_bytes=32 * 1024 * 1024),
    )(x3)

    # Tiny per-image epilogue in plain JAX (~10 FLOPs per image).
    row_sums = partial.sum(axis=(0, 2, 3))           # (rows,) f32
    mean_rgb = (row_sums / float(hw)).reshape(b, 3)
    mr, mg, mb_ = mean_rgb[:, 0], mean_rgb[:, 1], mean_rgb[:, 2]
    drg = (mr - mg) ** 2
    drb = (mr - mb_) ** 2
    dgb = (mb_ - mg) ** 2
    kk = jnp.sqrt(drg ** 2 + drb ** 2 + dgb ** 2)
    return kk.reshape(b, 1, 1, 1).astype(x.dtype)


if __name__ == "__main__":
    key = jax.random.PRNGKey(0)
    x = jax.random.uniform(key, (2, 3, 16, 16), dtype=jnp.float32)

    k = jax.jit(l_color)(x)
    jax.block_until_ready(k)

    # plain-JAX reference (same math as the torch module)
    mean_rgb = jnp.mean(x, axis=(2, 3), keepdims=True)
    mr, mg, mb = mean_rgb[:, 0:1], mean_rgb[:, 1:2], mean_rgb[:, 2:3]
    drg = (mr - mg) ** 2
    drb = (mr - mb) ** 2
    dgb = (mb - mg) ** 2
    k_ref = jnp.sqrt(drg ** 2 + drb ** 2 + dgb ** 2)

    assert k.shape == (2, 1, 1, 1)
    assert jnp.allclose(k, k_ref, rtol=1e-5, atol=1e-6)
    print("KERNEL_OK")
</pallas_src>

<mosaic_0001>
module attributes {stable_mosaic.version = 11 : i64} {
  func.func @_row_sum_kernel(%arg0: i32, %arg1: i32, %arg2: i32, %arg3: memref<6x2x128xf32, #tpu.memory_space<vmem>>, %arg4: memref<1x6x8x128xf32, #tpu.memory_space<vmem>>) attributes {dimension_semantics = [#tpu.dimension_semantics<parallel>, #tpu.dimension_semantics<parallel>, #tpu.dimension_semantics<arbitrary>], iteration_bounds = array<i64: 1, 1, 1>, scalar_prefetch = 0 : i64, scratch_operands = 0 : i64, tpu.core_type = #tpu.core_type<tc>, window_params = [{transform_indices = @transform_0, window_bounds = array<i64: 6, 2, 128>}, {transform_indices = @transform_1, window_bounds = array<i64: 1, 6, 8, 128>}]} {
    %c0_i32 = arith.constant 0 : i32
    %0 = arith.cmpi eq, %arg2, %c0_i32 : i32
    %1 = arith.extui %0 : i1 to i32
    %c0_i32_0 = arith.constant 0 : i32
    %2 = arith.cmpi ne, %1, %c0_i32_0 : i32
    scf.if %2 {
      %cst = arith.constant 0.000000e+00 : f32
      %13 = vector.broadcast %cst : f32 to vector<6x8x128xf32>
      %c0 = arith.constant 0 : index
      %c0_5 = arith.constant 0 : index
      %c0_6 = arith.constant 0 : index
      %c0_7 = arith.constant 0 : index
      %14 = vector.load %arg4[%c0, %c0_5, %c0_6, %c0_7] : memref<1x6x8x128xf32, #tpu.memory_space<vmem>>, vector<1x6x8x128xf32>
      %15 = vector.shape_cast %14 : vector<1x6x8x128xf32> to vector<6x8x128xf32>
      %16 = vector.shape_cast %13 : vector<6x8x128xf32> to vector<1x6x8x128xf32>
      tpu.vector_store %arg4[%c0, %c0_5, %c0_6, %c0_7], %16 {strides = array<i32>} : memref<1x6x8x128xf32, #tpu.memory_space<vmem>>, vector<1x6x8x128xf32>,
    } else {
    }
    %c1_i32 = arith.constant 1 : i32
    %3 = arith.muli %arg1, %c1_i32 : i32
    %4 = arith.addi %3, %arg2 : i32
    %c2_i32 = arith.constant 2 : i32
    %5 = arith.muli %4, %c2_i32 : i32
    %c2_i32_1 = arith.constant 2 : i32
    %6 = arith.addi %5, %c2_i32_1 : i32
    %c2_i32_2 = arith.constant 2 : i32
    %7 = arith.cmpi sle, %6, %c2_i32_2 : i32
    %8 = arith.extui %7 : i1 to i32
    %c0_i32_3 = arith.constant 0 : i32
    %9 = arith.cmpi ne, %8, %c0_i32_3 : i32
    scf.if %9 {
      %cst = arith.constant 0.000000e+00 : f32
      %13 = vector.broadcast %cst : f32 to vector<6x8x128xf32>
      %c0 = arith.constant 0 : index
      %c0_5 = arith.constant 0 : index
      %c0_6 = arith.constant 0 : index
      %c0_7 = arith.constant 0 : index
      %14 = vector.load %arg4[%c0, %c0_5, %c0_6, %c0_7] : memref<1x6x8x128xf32, #tpu.memory_space<vmem>>, vector<1x6x8x128xf32>
      %15 = vector.shape_cast %14 : vector<1x6x8x128xf32> to vector<6x8x128xf32>
      %16 = arith.addf %15, %13 : vector<6x8x128xf32>
      %c0_8 = arith.constant 0 : index
      %c0_9 = arith.constant 0 : index
      %c0_10 = arith.constant 0 : index
      %c0_11 = arith.constant 0 : index
      %17 = vector.load %arg4[%c0_8, %c0_9, %c0_10, %c0_11] : memref<1x6x8x128xf32, #tpu.memory_space<vmem>>, vector<1x6x8x128xf32>
      %18 = vector.shape_cast %17 : vector<1x6x8x128xf32> to vector<6x8x128xf32>
      %19 = vector.shape_cast %16 : vector<6x8x128xf32> to vector<1x6x8x128xf32>
      tpu.vector_store %arg4[%c0_8, %c0_9, %c0_10, %c0_11], %19 {strides = array<i32>} : memref<1x6x8x128xf32, #tpu.memory_space<vmem>>, vector<1x6x8x128xf32>,
      %c0_12 = arith.constant 0 : index
      %c0_13 = arith.constant 0 : index
      %c0_14 = arith.constant 0 : index
      %20 = vector.load %arg3[%c0_12, %c0_13, %c0_14] : memref<6x2x128xf32, #tpu.memory_space<vmem>>, vector<6x2x128xf32>
      %c0_15 = arith.constant 0 : index
      %c0_16 = arith.constant 0 : index
      %c0_17 = arith.constant 0 : index
      %c0_18 = arith.constant 0 : index
      %21 = vector.load %arg4[%c0_15, %c0_16, %c0_17, %c0_18] : memref<1x6x8x128xf32, #tpu.memory_space<vmem>>, vector<1x6x2x128xf32>
      %22 = vector.shape_cast %21 : vector<1x6x2x128xf32> to vector<6x2x128xf32>
      %23 = arith.addf %22, %20 : vector<6x2x128xf32>
      %c0_19 = arith.constant 0 : index
      %c0_20 = arith.constant 0 : index
      %c0_21 = arith.constant 0 : index
      %c0_22 = arith.constant 0 : index
      %24 = vector.load %arg4[%c0_19, %c0_20, %c0_21, %c0_22] : memref<1x6x8x128xf32, #tpu.memory_space<vmem>>, vector<1x6x2x128xf32>
      %25 = vector.shape_cast %24 : vector<1x6x2x128xf32> to vector<6x2x128xf32>
      %26 = vector.shape_cast %23 : vector<6x2x128xf32> to vector<1x6x2x128xf32>
      tpu.vector_store %arg4[%c0_19, %c0_20, %c0_21, %c0_22], %26 {strides = array<i32>} : memref<1x6x8x128xf32, #tpu.memory_space<vmem>>, vector<1x6x2x128xf32>,
    } else {
    }
    %true = arith.constant true
    %10 = arith.xori %7, %true : i1
    %11 = arith.extui %10 : i1 to i32
    %c0_i32_4 = arith.constant 0 : i32
    %12 = arith.cmpi ne, %11, %c0_i32_4 : i32
    scf.if %12 {
      %cst = arith.constant 0.000000e+00 : f32
      %13 = vector.broadcast %cst : f32 to vector<6x8x128xf32>
      %c0 = arith.constant 0 : index
      %c0_5 = arith.constant 0 : index
      %c0_6 = arith.constant 0 : index
      %c0_7 = arith.constant 0 : index
      %14 = vector.load %arg4[%c0, %c0_5, %c0_6, %c0_7] : memref<1x6x8x128xf32, #tpu.memory_space<vmem>>, vector<1x6x8x128xf32>
      %15 = vector.shape_cast %14 : vector<1x6x8x128xf32> to vector<6x8x128xf32>
      %16 = arith.addf %15, %13 : vector<6x8x128xf32>
      %c0_8 = arith.constant 0 : index
      %c0_9 = arith.constant 0 : index
      %c0_10 = arith.constant 0 : index
      %c0_11 = arith.constant 0 : index
      %17 = vector.load %arg4[%c0_8, %c0_9, %c0_10, %c0_11] : memref<1x6x8x128xf32, #tpu.memory_space<vmem>>, vector<1x6x8x128xf32>
      %18 = vector.shape_cast %17 : vector<1x6x8x128xf32> to vector<6x8x128xf32>
      %19 = vector.shape_cast %16 : vector<6x8x128xf32> to vector<1x6x8x128xf32>
      tpu.vector_store %arg4[%c0_8, %c0_9, %c0_10, %c0_11], %19 {strides = array<i32>} : memref<1x6x8x128xf32, #tpu.memory_space<vmem>>, vector<1x6x8x128xf32>,
      %c0_12 = arith.constant 0 : index
      %c0_13 = arith.constant 0 : index
      %c0_14 = arith.constant 0 : index
      %20 = vector.load %arg3[%c0_12, %c0_13, %c0_14] : memref<6x2x128xf32, #tpu.memory_space<vmem>>, vector<6x2x128xf32>
      %c0_i32_15 = arith.constant 0 : i32
      %21 = arith.addi %5, %c0_i32_15 : i32
      %22 = tpu.iota {dimensions = array<i32: 1>} : vector<6x2x128xi32>
      %23 = vector.broadcast %21 : i32 to vector<6x2x128xi32>
      %24 = arith.addi %23, %22 : vector<6x2x128xi32>
      %c2_i32_16 = arith.constant 2 : i32
      %25 = vector.broadcast %c2_i32_16 : i32 to vector<6x2x128xi32>
      %26 = arith.cmpi slt, %24, %25 : vector<6x2x128xi32>
      %cst_17 = arith.constant 0.000000e+00 : f32
      %27 = vector.broadcast %cst_17 : f32 to vector<6x2x128xf32>
      %28 = arith.select %26, %20, %27 : vector<6x2x128xi1>, vector<6x2x128xf32>
      %c0_18 = arith.constant 0 : index
      %c0_19 = arith.constant 0 : index
      %c0_20 = arith.constant 0 : index
      %c0_21 = arith.constant 0 : index
      %29 = vector.load %arg4[%c0_18, %c0_19, %c0_20, %c0_21] : memref<1x6x8x128xf32, #tpu.memory_space<vmem>>, vector<1x6x2x128xf32>
      %30 = vector.shape_cast %29 : vector<1x6x2x128xf32> to vector<6x2x128xf32>
      %31 = arith.addf %30, %28 : vector<6x2x128xf32>
      %c0_22 = arith.constant 0 : index
      %c0_23 = arith.constant 0 : index
      %c0_24 = arith.constant 0 : index
      %c0_25 = arith.constant 0 : index
      %32 = vector.load %arg4[%c0_22, %c0_23, %c0_24, %c0_25] : memref<1x6x8x128xf32, #tpu.memory_space<vmem>>, vector<1x6x2x128xf32>
      %33 = vector.shape_cast %32 : vector<1x6x2x128xf32> to vector<6x2x128xf32>
      %34 = vector.shape_cast %31 : vector<6x2x128xf32> to vector<1x6x2x128xf32>
      tpu.vector_store %arg4[%c0_22, %c0_23, %c0_24, %c0_25], %34 {strides = array<i32>} : memref<1x6x8x128xf32, #tpu.memory_space<vmem>>, vector<1x6x2x128xf32>,
    } else {
    }
    return
  }
  func.func @transform_0(%arg0: i32, %arg1: i32, %arg2: i32) -> (i32, i32, i32) {
    %c1_i32 = arith.constant 1 : i32
    %0 = arith.muli %arg1, %c1_i32 : i32
    %1 = arith.addi %0, %arg2 : i32
    %c0_i32 = arith.constant 0 : i32
    %2 = arith.minsi %1, %c0_i32 : i32
    %c0_i32_0 = arith.constant 0 : i32
    %c0_i32_1 = arith.constant 0 : i32
    return %arg0, %2, %c0_i32_0 : i32, i32, i32
  }
  func.func @transform_1(%arg0: i32, %arg1: i32, %arg2: i32) -> (i32, i32, i32, i32) {
    %c0_i32 = arith.constant 0 : i32
    %c0_i32_0 = arith.constant 0 : i32
    %c0_i32_1 = arith.constant 0 : i32
    return %arg1, %arg0, %c0_i32, %c0_i32_0 : i32, i32, i32, i32
  }
}

</mosaic_0001>

<bundles_post_ra>
// kernel: l_color.1
= control target key start
LH: loop header
LB: loop body
LE: loop exit
PB: predicated region body
PF: predicated region fallthrough
CT: control target
= control target key end

     0   :  { %v162_v0 = vmov 0.0   ;;  %s245_s1 = inlined_call_operand.vmem [shape: f32[1,6,8,128], index: 1, kind: output, shape index: {}]   ;;  %s246_s0 = inlined_call_operand.vmem [shape: f32[6,2,128], index: 0, kind: input, shape index: {}]  }
   0x1   :  { %64 = vst [vmem:[%s245_s1] sm:$0xff] %v162_v0  ;;  %65 = vst [vmem:[%s245_s1 + $0x8] sm:$0xff] %v162_v0  ;;  %v70_v1 = vld [vmem:[%s246_s0] sm:$0x3]  ;;  %v71_v2 = vld [vmem:[%s246_s0 + $0x2] sm:$0x3] }
   0x2   :  { %66 = vst [vmem:[%s245_s1 + $0x10] sm:$0xff] %v162_v0  ;;  %67 = vst [vmem:[%s245_s1 + $0x18] sm:$0xff] %v162_v0  ;;  %v72_v3 = vld [vmem:[%s246_s0 + $0x4] sm:$0x3]  ;;  %v73_v4 = vld [vmem:[%s246_s0 + $0x6] sm:$0x3] }
   0x3   :  { %68 = vst [vmem:[%s245_s1 + $0x20] sm:$0xff] %v162_v0  ;;  %69 = vst [vmem:[%s245_s1 + $0x28] sm:$0xff] %v162_v0  ;;  %v74_v5 = vld [vmem:[%s246_s0 + $0x8] sm:$0x3]  ;;  %v75_v6 = vld [vmem:[%s246_s0 + $0xa] sm:$0x3] }
   0x8   :  { %v76_v7 = vld [vmem:[%s245_s1] sm:$0x3]  ;;  %v77_v8 = vld [vmem:[%s245_s1 + $0x8] sm:$0x3] }
   0x9   :  { %v78_v9 = vld [vmem:[%s245_s1 + $0x10] sm:$0x3]  ;;  %v82_v10 = vadd.f32 %v76_v7, %v70_v1  ;;  %v83_v11 = vadd.f32 %v77_v8, %v71_v2  ;;  %v79_v13 = vld [vmem:[%s245_s1 + $0x18] sm:$0x3] }
   0xa   :  { %v84_v12 = vadd.f32 %v78_v9, %v72_v3  ;;  %v80_v14 = vld [vmem:[%s245_s1 + $0x20] sm:$0x3]  ;;  %v81_v15 = vld [vmem:[%s245_s1 + $0x28] sm:$0x3]  ;;  %v85_v16 = vadd.f32 %v79_v13, %v73_v4 }
   0xb   :  { %v86_v17 = vadd.f32 %v80_v14, %v74_v5  ;;  %v87_v18 = vadd.f32 %v81_v15, %v75_v6  ;;  %88 = vst [vmem:[%s245_s1] sm:$0x3] %v82_v10  ;;  %89 = vst [vmem:[%s245_s1 + $0x8] sm:$0x3] %v83_v11 }
   0xc   :  { %90 = vst [vmem:[%s245_s1 + $0x10] sm:$0x3] %v84_v12  ;;  %91 = vst [vmem:[%s245_s1 + $0x18] sm:$0x3] %v85_v16 }
   0xd   :  { %92 = vst [vmem:[%s245_s1 + $0x20] sm:$0x3] %v86_v17  ;;  %93 = vst [vmem:[%s245_s1 + $0x28] sm:$0x3] %v87_v18 }

</bundles_post_ra>
